<compile_context>
chip_gen: v7x
topology: tpu7x:2x2x1
jax: 0.10.0
libtpu: 0.0.40
codegen_flags: <defaults>
</compile_context>

<pallas_src>
import math

import jax
import jax.numpy as jnp
from jax.experimental import pallas as pl
from jax.experimental.pallas import tpu as pltpu


# ----------------------------------------------------------------------------
# Tile / VMEM sizing helpers
# ----------------------------------------------------------------------------
def _lcm(a, b):
    return a * b // math.gcd(a, b)


def _vmem_capacity_bytes():
    try:
        return int(pltpu.get_tpu_info().vmem_capacity_bytes)
    except Exception:
        return 128 * 1024 * 1024  # v5e/v6e default


def _pick_rows(t, H, th_align):
    """Largest row-count <= t that satisfies alignment; prefers divisors of H."""
    if t >= H:
        return H
    t = max(th_align, (t // th_align) * th_align)
    if t >= H:
        return H
    for cand in range(t, 0, -th_align):
        if H % cand == 0:
            return cand
    return t


def _choose_tiles(N, C_in, Nout, H, W, s, dtype_bytes, tile_budget,
                  step_bytes_target=4 * 1024 * 1024, nb_max=8):
    """Pick (nb images per step, th input rows per step)."""
    # Alignment: (a) flat input block th*W must be a multiple of 128 lanes
    # (or the full H*W), (b) output block second-minor dim th*s must be a
    # multiple of 8 (or the full H*s).  th == H always satisfies both.
    th_align = _lcm(128 // math.gcd(W, 128), 8 // math.gcd(s, 8))

    row_bytes = (C_in + Nout) * W * dtype_bytes       # HBM bytes (in+out) per input row
    per_image_bytes = H * row_bytes
    step_bytes_target = max(1, min(step_bytes_target, tile_budget // 3))
    # VMEM cap on rows per step: double-buffered in/out blocks + compute slack.
    max_rows = max(th_align, int(tile_budget // (2.5 * row_bytes)))

    if per_image_bytes >= step_bytes_target:
        nb = 1
        th = _pick_rows(min(max_rows, max(1, step_bytes_target // row_bytes)),
                        H, th_align)
    else:
        th = _pick_rows(min(H, max_rows), H, th_align)
        nb = max(1, min(nb_max, N,
                        step_bytes_target // per_image_bytes,
                        max_rows // max(th, 1)))
        while N % nb:                       # keep batch blocks exact
            nb -= 1

    # Megacore: guarantee >=2 grid steps (v7x has 2 TCs); aim for 4 only when
    # each step would still move a non-trivial amount of data.
    cdiv = lambda a, b: -(-a // b)
    min_steps = 4 if N * per_image_bytes >= 4 * (256 << 10) else 2
    while cdiv(N, nb) * cdiv(H, th) < min_steps:
        if nb > 1:
            nb -= 1
            while N % nb:
                nb -= 1
        elif th > th_align:
            new_th = _pick_rows(th // 2, H, th_align)
            if new_th >= th:
                break
            th = new_th
        else:
            break
    return nb, th


# ----------------------------------------------------------------------------
# Fused kernel: matmul + depth-to-space, writes final NCHW blocks directly
# ----------------------------------------------------------------------------
def _make_fused_kernel(nb, s, th, W):
    def kernel(x_ref, w_ref, b_ref, o_ref):
        # x_ref: (nb, C_in, th*W)        flat spatial tile, lane-dense
        # w_ref: (s*s, C_out, C_in)      resident (constant index map)
        # b_ref: (C_out, 1)              resident
        # o_ref: (nb, C_out, th*s, W*s)  final NCHW output block
        b = b_ref[...]
        for ib in range(nb):
            x = x_ref[ib]                                    # (C_in, th*W)
            for kh in range(s):
                for kw in range(s):
                    y = jnp.dot(w_ref[kh * s + kw], x,
                                preferred_element_type=jnp.float32) + b
                    y = y.reshape(y.shape[0], th, W).astype(o_ref.dtype)
                    # out[n, co, r*s+kh, c*s+kw] = y[co, r, c]
                    o_ref[ib, :,
                          pl.ds(kh, th, stride=s),
                          pl.ds(kw, W, stride=s)] = y
    return kernel


def _up_forward_fused(x, weight, bias, s, out_dtype, vmem_limit, nb, th):
    N, C_in, H, W = x.shape
    C_out = weight.shape[1]
    tm = th * W

    # Tiny parameter reshuffles (weight/bias only).
    # w_k[kh*s+kw, co, ci] = weight[ci, co, kh, kw]
    w_k = jnp.transpose(weight, (2, 3, 1, 0)).reshape(s * s, C_out, C_in)
    b2 = bias.reshape(C_out, 1)

    grid = (pl.cdiv(N, nb), pl.cdiv(H, th))
    return pl.pallas_call(
        _make_fused_kernel(nb, s, th, W),
        out_shape=jax.ShapeDtypeStruct((N, C_out, H * s, W * s), out_dtype),
        grid_spec=pltpu.PrefetchScalarGridSpec(
            num_scalar_prefetch=0,
            grid=grid,
            in_specs=[
                pl.BlockSpec((nb, C_in, tm), lambda n, t: (n, 0, t)),
                pl.BlockSpec((s * s, C_out, C_in), lambda n, t: (0, 0, 0)),
                pl.BlockSpec((C_out, 1), lambda n, t: (0, 0)),
            ],
            out_specs=pl.BlockSpec((nb, C_out, th * s, W * s),
                                   lambda n, t: (n, 0, t, 0)),
        ),
        compiler_params=pltpu.CompilerParams(
            dimension_semantics=("parallel", "parallel"),
            vmem_limit_bytes=vmem_limit,
        ),
    )(x.reshape(N, C_in, H * W), w_k, b2)


# ----------------------------------------------------------------------------
# Unfused fallback (proven path): lane-dense matmul + XLA depth-to-space
# ----------------------------------------------------------------------------
def _up_matmul_kernel(x_ref, w_ref, b_ref, o_ref):
    acc = jnp.dot(w_ref[...], x_ref[...], preferred_element_type=jnp.float32)
    o_ref[...] = (acc + b_ref[...]).astype(o_ref.dtype)


def _up_forward_unfused(x, weight, bias, s, out_dtype, vmem_limit, tile_budget):
    N, C_in, H, W = x.shape
    C_out = weight.shape[1]
    Nout = C_out * s * s
    HW = H * W

    x_mat = x.reshape(N, C_in, HW)
    w_mat = jnp.transpose(weight, (1, 2, 3, 0)).reshape(Nout, C_in)
    b_mat = jnp.repeat(bias, s * s).reshape(Nout, 1)

    bytes_per_col = (C_in + Nout) * x.dtype.itemsize
    cols = max(128, tile_budget // (3 * bytes_per_col))
    tm = HW if (cols >= HW or HW <= 128) else (cols // 128) * 128

    out_mat = pl.pallas_call(
        _up_matmul_kernel,
        out_shape=jax.ShapeDtypeStruct((N, Nout, HW), out_dtype),
        grid_spec=pltpu.PrefetchScalarGridSpec(
            num_scalar_prefetch=0,
            grid=(N, pl.cdiv(HW, tm)),
            in_specs=[
                pl.BlockSpec((None, C_in, tm), lambda n, t: (n, 0, t)),
                pl.BlockSpec((Nout, C_in), lambda n, t: (0, 0)),
                pl.BlockSpec((Nout, 1), lambda n, t: (0, 0)),
            ],
            out_specs=pl.BlockSpec((None, Nout, tm), lambda n, t: (n, 0, t)),
        ),
        compiler_params=pltpu.CompilerParams(
            dimension_semantics=("parallel", "parallel"),
            vmem_limit_bytes=vmem_limit,
        ),
    )(x_mat, w_mat, b_mat)

    out = out_mat.reshape(N, C_out, s, s, H, W)
    return jnp.transpose(out, (0, 1, 4, 2, 5, 3)).reshape(N, C_out, H * s, W * s)


# ----------------------------------------------------------------------------
# Public entry point
# ----------------------------------------------------------------------------
_FUSED_STATE = None  # None: untried, True: fused path validated, False: fall back


def up_forward(x, weight, bias, scale_factor=2, *, out_dtype=None):
    """Equivalent of Up(channels, scale_factor, bilinear=False).forward(x).

    x:      (N, C_in, H, W)        float32
    weight: (C_in, C_out, s, s)    ConvTranspose2d weight (PyTorch layout)
    bias:   (C_out,)               ConvTranspose2d bias
    out_dtype: optional narrower output dtype (e.g. jnp.bfloat16) — MXU
               accumulation stays f32, only the store is cast.
    returns (N, C_out, H*s, W*s)
    """
    global _FUSED_STATE
    s = int(scale_factor)
    N, C_in, H, W = x.shape
    C_out = weight.shape[1]
    Nout = C_out * s * s
    if out_dtype is None:
        out_dtype = x.dtype

    # Unified, generation-aware VMEM accounting (32 MiB on v7x, 64 MiB on v5e/v6e).
    vmem_cap = _vmem_capacity_bytes()
    vmem_limit = min(vmem_cap // 2, 64 * 1024 * 1024)
    tile_budget = int(vmem_limit * 0.7)

    nb, th = _choose_tiles(N, C_in, Nout, H, W, s,
                           x.dtype.itemsize, tile_budget)

    if _FUSED_STATE is not False:
        try:
            out = _up_forward_fused(x, weight, bias, s, out_dtype,
                                    vmem_limit, nb, th)
            if _FUSED_STATE is None:
                jax.block_until_ready(out)   # validate lowering + execution once
                _FUSED_STATE = True
            return out
        except Exception:
            _FUSED_STATE = False             # e.g. reshape/strided-store lowering gap
    return _up_forward_unfused(x, weight, bias, s, out_dtype,
                               vmem_limit, tile_budget)


def up_reference(x, weight, bias, scale_factor=2):
    """Pure-JAX reference (einsum formulation of ConvTranspose2d k=s, stride=s)."""
    N, C_in, H, W = x.shape
    s = scale_factor
    C_out = weight.shape[1]
    # out[n, co, i*s+kh, j*s+kw] = sum_ci x[n,ci,i,j] * W[ci,co,kh,kw] + b[co]
    y = jnp.einsum("ncij,cokl->noikjl", x, weight)
    y = y.reshape(N, C_out, H * s, W * s) + bias[None, :, None, None]
    return y


if __name__ == "__main__":
    # Up(channels=4, scale_factor=2, bilinear=False)
    N, C, H, W = 2, 4, 16, 16
    scale = 2
    C_out = C // scale

    key = jax.random.PRNGKey(0)
    kx, kw_, kb = jax.random.split(key, 3)
    x = jax.random.normal(kx, (N, C, H, W), dtype=jnp.float32)
    # deterministic synthetic parameters (shapes per nn.ConvTranspose2d(C, C//2, 2, 2))
    weight = 0.1 * jax.random.normal(kw_, (C, C_out, scale, scale), dtype=jnp.float32)
    bias = 0.1 * jax.random.normal(kb, (C_out,), dtype=jnp.float32)

    out = up_forward(x, weight, bias, scale_factor=scale)
    out = jax.block_until_ready(out)

    ref = up_reference(x, weight, bias, scale_factor=scale)
    assert out.shape == (N, C_out, H * scale, W * scale)
    assert jnp.allclose(out, ref, atol=1e-5, rtol=1e-5)

    print("KERNEL_OK")
</pallas_src>

<mosaic_0001>
module attributes {stable_mosaic.version = 11 : i64} {
  func.func @kernel(%arg0: i32, %arg1: i32, %arg2: memref<1x4x256xf32, #tpu.memory_space<vmem>>, %arg3: memref<4x2x4xf32, #tpu.memory_space<vmem>>, %arg4: memref<2x1xf32, #tpu.memory_space<vmem>>, %arg5: memref<1x2x32x32xf32, #tpu.memory_space<vmem>>) attributes {dimension_semantics = [#tpu.dimension_semantics<parallel>, #tpu.dimension_semantics<parallel>], iteration_bounds = array<i64: 2, 1>, scalar_prefetch = 0 : i64, scratch_operands = 0 : i64, tpu.core_type = #tpu.core_type<tc>, window_params = [{transform_indices = @transform_0, window_bounds = array<i64: 1, 4, 256>}, {pipeline_mode = #tpu.pipeline_mode<synchronous>, transform_indices = @transform_1, window_bounds = array<i64: 4, 2, 4>}, {pipeline_mode = #tpu.pipeline_mode<synchronous>, transform_indices = @transform_2, window_bounds = array<i64: 2, 1>}, {transform_indices = @transform_3, window_bounds = array<i64: 1, 2, 32, 32>}]} {
    %c0 = arith.constant 0 : index
    %c0_0 = arith.constant 0 : index
    %0 = vector.load %arg4[%c0, %c0_0] : memref<2x1xf32, #tpu.memory_space<vmem>>, vector<2x1xf32>
    %c0_1 = arith.constant 0 : index
    %c0_2 = arith.constant 0 : index
    %c0_3 = arith.constant 0 : index
    %1 = vector.load %arg2[%c0_1, %c0_2, %c0_3] : memref<1x4x256xf32, #tpu.memory_space<vmem>>, vector<1x4x256xf32>
    %2 = vector.shape_cast %1 : vector<1x4x256xf32> to vector<4x256xf32>
    %c0_4 = arith.constant 0 : index
    %c0_5 = arith.constant 0 : index
    %c0_6 = arith.constant 0 : index
    %3 = vector.load %arg3[%c0_4, %c0_5, %c0_6] : memref<4x2x4xf32, #tpu.memory_space<vmem>>, vector<1x2x4xf32>
    %4 = vector.shape_cast %3 : vector<1x2x4xf32> to vector<2x4xf32>
    %cst = arith.constant dense<0.000000e+00> : vector<2x256xf32>
    %5 = tpu.matmul %4, %2, %cst {dimension_numbers = #tpu.dot_dimension_numbers<[1], [0], [0], [1], [0, 0, 1, 1], [], []>} : vector<2x4xf32>, vector<4x256xf32>, vector<2x256xf32> -> vector<2x256xf32>
    %6 = vector.broadcast %0 : vector<2x1xf32> to vector<2x256xf32>
    %7 = arith.addf %5, %6 : vector<2x256xf32>
    %8 = vector.shape_cast %7 : vector<2x256xf32> to vector<2x16x16xf32>
    %c0_7 = arith.constant 0 : index
    %c0_8 = arith.constant 0 : index
    %c0_9 = arith.constant 0 : index
    %c0_10 = arith.constant 0 : index
    %9 = tpu.strided_load %arg5[%c0_7, %c0_8, %c0_9, %c0_10] {strides = array<i32: 1, 1, 2, 2>} : memref<1x2x32x32xf32, #tpu.memory_space<vmem>>, vector<1x2x16x16xf32>
    %10 = vector.shape_cast %9 : vector<1x2x16x16xf32> to vector<2x16x16xf32>
    %11 = vector.shape_cast %8 : vector<2x16x16xf32> to vector<1x2x16x16xf32>
    tpu.strided_store %arg5[%c0_7, %c0_8, %c0_9, %c0_10], %11 {strides = array<i32: 1, 1, 2, 2>} : memref<1x2x32x32xf32, #tpu.memory_space<vmem>>, vector<1x2x16x16xf32>
    %c1 = arith.constant 1 : index
    %c0_11 = arith.constant 0 : index
    %c0_12 = arith.constant 0 : index
    %12 = vector.load %arg3[%c1, %c0_11, %c0_12] : memref<4x2x4xf32, #tpu.memory_space<vmem>>, vector<1x2x4xf32>
    %13 = vector.shape_cast %12 : vector<1x2x4xf32> to vector<2x4xf32>
    %cst_13 = arith.constant dense<0.000000e+00> : vector<2x256xf32>
    %14 = tpu.matmul %13, %2, %cst_13 {dimension_numbers = #tpu.dot_dimension_numbers<[1], [0], [0], [1], [0, 0, 1, 1], [], []>} : vector<2x4xf32>, vector<4x256xf32>, vector<2x256xf32> -> vector<2x256xf32>
    %15 = vector.broadcast %0 : vector<2x1xf32> to vector<2x256xf32>
    %16 = arith.addf %14, %15 : vector<2x256xf32>
    %17 = vector.shape_cast %16 : vector<2x256xf32> to vector<2x16x16xf32>
    %c0_14 = arith.constant 0 : index
    %c0_15 = arith.constant 0 : index
    %c0_16 = arith.constant 0 : index
    %c1_17 = arith.constant 1 : index
    %18 = tpu.strided_load %arg5[%c0_14, %c0_15, %c0_16, %c1_17] {strides = array<i32: 1, 1, 2, 2>} : memref<1x2x32x32xf32, #tpu.memory_space<vmem>>, vector<1x2x16x16xf32>
    %19 = vector.shape_cast %18 : vector<1x2x16x16xf32> to vector<2x16x16xf32>
    %20 = vector.shape_cast %17 : vector<2x16x16xf32> to vector<1x2x16x16xf32>
    tpu.strided_store %arg5[%c0_14, %c0_15, %c0_16, %c1_17], %20 {strides = array<i32: 1, 1, 2, 2>} : memref<1x2x32x32xf32, #tpu.memory_space<vmem>>, vector<1x2x16x16xf32>
    %c2 = arith.constant 2 : index
    %c0_18 = arith.constant 0 : index
    %c0_19 = arith.constant 0 : index
    %21 = vector.load %arg3[%c2, %c0_18, %c0_19] : memref<4x2x4xf32, #tpu.memory_space<vmem>>, vector<1x2x4xf32>
    %22 = vector.shape_cast %21 : vector<1x2x4xf32> to vector<2x4xf32>
    %cst_20 = arith.constant dense<0.000000e+00> : vector<2x256xf32>
    %23 = tpu.matmul %22, %2, %cst_20 {dimension_numbers = #tpu.dot_dimension_numbers<[1], [0], [0], [1], [0, 0, 1, 1], [], []>} : vector<2x4xf32>, vector<4x256xf32>, vector<2x256xf32> -> vector<2x256xf32>
    %24 = vector.broadcast %0 : vector<2x1xf32> to vector<2x256xf32>
    %25 = arith.addf %23, %24 : vector<2x256xf32>
    %26 = vector.shape_cast %25 : vector<2x256xf32> to vector<2x16x16xf32>
    %c0_21 = arith.constant 0 : index
    %c0_22 = arith.constant 0 : index
    %c1_23 = arith.constant 1 : index
    %c0_24 = arith.constant 0 : index
    %27 = tpu.strided_load %arg5[%c0_21, %c0_22, %c1_23, %c0_24] {strides = array<i32: 1, 1, 2, 2>} : memref<1x2x32x32xf32, #tpu.memory_space<vmem>>, vector<1x2x16x16xf32>
    %28 = vector.shape_cast %27 : vector<1x2x16x16xf32> to vector<2x16x16xf32>
    %29 = vector.shape_cast %26 : vector<2x16x16xf32> to vector<1x2x16x16xf32>
    tpu.strided_store %arg5[%c0_21, %c0_22, %c1_23, %c0_24], %29 {strides = array<i32: 1, 1, 2, 2>} : memref<1x2x32x32xf32, #tpu.memory_space<vmem>>, vector<1x2x16x16xf32>
    %c3 = arith.constant 3 : index
    %c0_25 = arith.constant 0 : index
    %c0_26 = arith.constant 0 : index
    %30 = vector.load %arg3[%c3, %c0_25, %c0_26] : memref<4x2x4xf32, #tpu.memory_space<vmem>>, vector<1x2x4xf32>
    %31 = vector.shape_cast %30 : vector<1x2x4xf32> to vector<2x4xf32>
    %cst_27 = arith.constant dense<0.000000e+00> : vector<2x256xf32>
    %32 = tpu.matmul %31, %2, %cst_27 {dimension_numbers = #tpu.dot_dimension_numbers<[1], [0], [0], [1], [0, 0, 1, 1], [], []>} : vector<2x4xf32>, vector<4x256xf32>, vector<2x256xf32> -> vector<2x256xf32>
    %33 = vector.broadcast %0 : vector<2x1xf32> to vector<2x256xf32>
    %34 = arith.addf %32, %33 : vector<2x256xf32>
    %35 = vector.shape_cast %34 : vector<2x256xf32> to vector<2x16x16xf32>
    %c0_28 = arith.constant 0 : index
    %c0_29 = arith.constant 0 : index
    %c1_30 = arith.constant 1 : index
    %c1_31 = arith.constant 1 : index
    %36 = tpu.strided_load %arg5[%c0_28, %c0_29, %c1_30, %c1_31] {strides = array<i32: 1, 1, 2, 2>} : memref<1x2x32x32xf32, #tpu.memory_space<vmem>>, vector<1x2x16x16xf32>
    %37 = vector.shape_cast %36 : vector<1x2x16x16xf32> to vector<2x16x16xf32>
    %38 = vector.shape_cast %35 : vector<2x16x16xf32> to vector<1x2x16x16xf32>
    tpu.strided_store %arg5[%c0_28, %c0_29, %c1_30, %c1_31], %38 {strides = array<i32: 1, 1, 2, 2>} : memref<1x2x32x32xf32, #tpu.memory_space<vmem>>, vector<1x2x16x16xf32>
    return
  }
  func.func @transform_0(%arg0: i32, %arg1: i32) -> (i32, i32, i32) {
    %c0_i32 = arith.constant 0 : i32
    %c0_i32_0 = arith.constant 0 : i32
    return %arg0, %c0_i32, %arg1 : i32, i32, i32
  }
  func.func @transform_1(%arg0: i32, %arg1: i32) -> (i32, i32, i32) {
    %c0_i32 = arith.constant 0 : i32
    %c0_i32_0 = arith.constant 0 : i32
    %c0_i32_1 = arith.constant 0 : i32
    %c0_i32_2 = arith.constant 0 : i32
    return %c0_i32, %c0_i32_0, %c0_i32_1 : i32, i32, i32
  }
  func.func @transform_2(%arg0: i32, %arg1: i32) -> (i32, i32) {
    %c0_i32 = arith.constant 0 : i32
    %c0_i32_0 = arith.constant 0 : i32
    %c0_i32_1 = arith.constant 0 : i32
    return %c0_i32, %c0_i32_0 : i32, i32
  }
  func.func @transform_3(%arg0: i32, %arg1: i32) -> (i32, i32, i32, i32) {
    %c0_i32 = arith.constant 0 : i32
    %c0_i32_0 = arith.constant 0 : i32
    %c0_i32_1 = arith.constant 0 : i32
    return %arg0, %c0_i32, %arg1, %c0_i32_0 : i32, i32, i32, i32
  }
}

module attributes {stable_mosaic.version = 11 : i64} {
  func.func @_up_matmul_kernel(%arg0: i32, %arg1: i32, %arg2: memref<1x4x256xf32, #tpu.memory_space<vmem>>, %arg3: memref<8x4xf32, #tpu.memory_space<vmem>>, %arg4: memref<8x1xf32, #tpu.memory_space<vmem>>, %arg5: memref<1x8x256xf32, #tpu.memory_space<vmem>>) attributes {dimension_semantics = [#tpu.dimension_semantics<parallel>, #tpu.dimension_semantics<parallel>], iteration_bounds = array<i64: 2, 1>, scalar_prefetch = 0 : i64, scratch_operands = 0 : i64, tpu.core_type = #tpu.core_type<tc>, window_params = [{transform_indices = @transform_0, window_bounds = array<i64: 1, 4, 256>}, {pipeline_mode = #tpu.pipeline_mode<synchronous>, transform_indices = @transform_1, window_bounds = array<i64: 8, 4>}, {pipeline_mode = #tpu.pipeline_mode<synchronous>, transform_indices = @transform_2, window_bounds = array<i64: 8, 1>}, {transform_indices = @transform_3, window_bounds = array<i64: 1, 8, 256>}]} {
    %c0 = arith.constant 0 : index
    %c0_0 = arith.constant 0 : index
    %0 = vector.load %arg3[%c0, %c0_0] : memref<8x4xf32, #tpu.memory_space<vmem>>, vector<8x4xf32>
    %c0_1 = arith.constant 0 : index
    %c0_2 = arith.constant 0 : index
    %c0_3 = arith.constant 0 : index
    %1 = vector.load %arg2[%c0_1, %c0_2, %c0_3] : memref<1x4x256xf32, #tpu.memory_space<vmem>>, vector<1x4x256xf32>
    %2 = vector.shape_cast %1 : vector<1x4x256xf32> to vector<4x256xf32>
    %cst = arith.constant dense<0.000000e+00> : vector<8x256xf32>
    %3 = tpu.matmul %0, %2, %cst {dimension_numbers = #tpu.dot_dimension_numbers<[1], [0], [0], [1], [0, 0, 1, 1], [], []>} : vector<8x4xf32>, vector<4x256xf32>, vector<8x256xf32> -> vector<8x256xf32>
    %c0_4 = arith.constant 0 : index
    %c0_5 = arith.constant 0 : index
    %4 = vector.load %arg4[%c0_4, %c0_5] : memref<8x1xf32, #tpu.memory_space<vmem>>, vector<8x1xf32>
    %5 = vector.broadcast %4 : vector<8x1xf32> to vector<8x256xf32>
    %6 = arith.addf %3, %5 : vector<8x256xf32>
    %c0_6 = arith.constant 0 : index
    %c0_7 = arith.constant 0 : index
    %c0_8 = arith.constant 0 : index
    %7 = vector.load %arg5[%c0_6, %c0_7, %c0_8] : memref<1x8x256xf32, #tpu.memory_space<vmem>>, vector<1x8x256xf32>
    %8 = vector.shape_cast %7 : vector<1x8x256xf32> to vector<8x256xf32>
    %9 = vector.shape_cast %6 : vector<8x256xf32> to vector<1x8x256xf32>
    tpu.vector_store %arg5[%c0_6, %c0_7, %c0_8], %9 {strides = array<i32>} : memref<1x8x256xf32, #tpu.memory_space<vmem>>, vector<1x8x256xf32>,
    return
  }
  func.func @transform_0(%arg0: i32, %arg1: i32) -> (i32, i32, i32) {
    %c0_i32 = arith.constant 0 : i32
    %c0_i32_0 = arith.constant 0 : i32
    return %arg0, %c0_i32, %arg1 : i32, i32, i32
  }
  func.func @transform_1(%arg0: i32, %arg1: i32) -> (i32, i32) {
    %c0_i32 = arith.constant 0 : i32
    %c0_i32_0 = arith.constant 0 : i32
    %c0_i32_1 = arith.constant 0 : i32
    return %c0_i32, %c0_i32_0 : i32, i32
  }
  func.func @transform_2(%arg0: i32, %arg1: i32) -> (i32, i32) {
    %c0_i32 = arith.constant 0 : i32
    %c0_i32_0 = arith.constant 0 : i32
    %c0_i32_1 = arith.constant 0 : i32
    return %c0_i32, %c0_i32_0 : i32, i32
  }
  func.func @transform_3(%arg0: i32, %arg1: i32) -> (i32, i32, i32) {
    %c0_i32 = arith.constant 0 : i32
    %c0_i32_0 = arith.constant 0 : i32
    return %arg0, %c0_i32, %arg1 : i32, i32, i32
  }
}

</mosaic_0001>

<bundles_post_ra>
// kernel: tpu_custom_call.1
= control target key start
LH: loop header
LB: loop body
LE: loop exit
PB: predicated region body
PF: predicated region fallthrough
CT: control target
= control target key end

     0   :  { %8 = vsyncpa [#allocation3], 0  ;;  %s999_s0 = inlined_call_operand.hbm [shape: f32[2,4,256], index: 0, kind: input, shape index: {}]   ;;  %s1000_s1 = inlined_call_operand.hbm [shape: f32[8,4], index: 1, kind: input, shape index: {}]   ;;  %s1001_s2 = inlined_call_operand.hbm [shape: f32[8,1], index: 2, kind: input, shape index: {}]   ;;  %s1002_s3 = inlined_call_operand.hbm [shape: f32[2,8,256], index: 3, kind: output, shape index: {}]  }
   0x1   :  { %10 = vsyncpa [#allocation3 + $0x1], 0 }
   0x2   :  { %11 = vsyncpa [#allocation6], 0 }
   0x3   :  { %12 = vsyncpa [#allocation4], 0 }
   0x4   :  { %14 = vsyncpa [#allocation4 + $0x1], 0  ;;  %s755_s12 = smov 0   ;;  %s757_s13 = smov 0  }
   0x5   :  { %s759_s14 = smov 0   ;;  %s761_s15 = smov 0  }
   0x6   :  { %s763_s16 = smov 0   ;;  %s765_s17 = smov 0  }
   0x7 LB: > { %s444_s18 = sadd.s32 4294967295, %s727_s17   ;;  %s445_s19 = sadd.s32 4294967294, %s727_s17   ;;  %s727_s17 = sphi %s765_s17, %s20_s17   ;;  %s723_s16 = sphi %s763_s16, %s1025_s16   ;;  %s719_s15 = sphi %s761_s15, %s1024_s15   ;;  %s715_s14 = sphi %s759_s14, %s1023_s14   ;;  %s711_s13 = sphi %s757_s13, %s1022_s13   ;;  %s707_s12 = sphi %s755_s12, %s1021_s12  }
   0x8   : > { %p54_p0 = scmp.ne.s32.totalorder %s711_s13, %s707_s12  ;;  %p789_p1 = scmp.eq.s32.totalorder %s444_s18, 0 }
   0x9   : > { %p793_p2 = scmp.eq.s32.totalorder %s444_s18, 1  ;;  %p128_p3 = scmp.eq.s32.totalorder %s445_s19, 1 }
   0xa   : > { %s1007_s20 = scalar_select %p789_p1, 1, 0 }
   0xb   : > { %s1008_s21 = scalar_select %p793_p2, 1, 0 }
   0xc   : > { %p799_p4 = por %p789_p1, %p54_p0  ;;  %p446_p5 = scmp.ge.s32.totalorder %s727_s17, 1 }
   0xd   : > { %p804_p6 = por %p128_p3, %p54_p0  ;;  %p135_p7 = scmp.lt.s32.totalorder %s727_s17, 3 }
   0xe   : > { %s1009_s22 = scalar_select %p799_p4, 1, 0 }
   0xf   : > { %s1010_s23 = scalar_select %p804_p6, 1, 0 }
  0x10   : > { %p809_p8 = pnand %p446_p5, %p135_p7  ;;  %s729_s25 = smov [#allocation5]  }
  0x11   : > { %s148_s26 = sshll.u32 %s729_s25, 4  ;;  %s730_s27 = smov [#allocation7]   ;;  %s149_s26 = int_to_ptr.vmem [resolvable:$true] %s148_s26 }
  0x12   : > { %s1011_s24 = scalar_select %p809_p8, 1, 0 }
  0x13   : > { %p480_p10 = pneg %p809_p8  ;;  %s159_s28 = sshll.u32 %s730_s27, 4  ;;  %s822_s28 = int_to_ptr.vmem [resolvable:$true] %s159_s28 }
  0x14   : > { %s555_s5 = scalar_lea.hbm %s1000_s1, 128 }
  0x15   : > { %p818_p11 = pnand %p480_p10, %p789_p1  ;;  %p556_p12 = scmp.ne.s32.totalorder %s1000_s1, %s555_s5 }
  0x16   : > { %p562_p5 = scmp.lt.u32.totalorder %s555_s5, %s1000_s1 }
  0x17   : > { %p557_p13 = pneg %p818_p11 }
  0x19   : > { %p558_p0 = pnand %p557_p13, %p556_p12 }
  0x1b   : > { %p559_p3 = pneg %p558_p0 }
  0x1d   : > { %p564_p7 = pnand %p562_p5, %p559_p3 }
  0x1f   : > { %567 = shalt.err (!%p564_p7)
}
  0x20   : > { %s568_s10 = scalar_lea.vmem %s149_s26, 128  ;;  %p576_p1 = scmp.lt.s32.totalorder %s149_s26, %s149_s26 }
  0x21   : > { %p569_p10 = scmp.ne.s32.totalorder %s149_s26, %s568_s10  ;;  %p577_p4 = scmp.lt.s32.totalorder %s568_s10, %s568_s10 }
  0x23   : > { %p571_p9 = pnand %p569_p10, %p557_p13  ;;  %p578_p8 = por %p577_p4, %p576_p1 }
  0x25   : > { %p572_p6 = pneg %p571_p9 }
  0x27   : > { %p579_p2 = pnand %p578_p8, %p572_p6 }
  0x29   : > { %582 = shalt.err (!%p579_p2)
}
  0x2a   : > { %483 = dma.hbm_to_vmem [thread:$0]  (!%p818_p11), %s1000_s1, 128, %s149_s26, [#allocation6]  }
  0x2b   : > { %s583_s27 = scalar_lea.hbm %s1001_s2, 128 }
  0x2c   : > { %p584_p9 = scmp.ne.s32.totalorder %s1001_s2, %s583_s27  ;;  %p590_p2 = scmp.lt.u32.totalorder %s583_s27, %s1001_s2 }
  0x2e   : > { %p586_p1 = pnand %p584_p9, %p557_p13 }
  0x30   : > { %p587_p4 = pneg %p586_p1 }
  0x32   : > { %p592_p6 = pnand %p590_p2, %p587_p4 }
  0x34   : > { %595 = shalt.err (!%p592_p6)
}
  0x35   : > { %s596_s26 = scalar_lea.vmem %s822_s28, 128  ;;  %p604_p3 = scmp.lt.s32.totalorder %s822_s28, %s822_s28 }
  0x36   : > { %p597_p8 = scmp.ne.s32.totalorder %s822_s28, %s596_s26  ;;  %p605_p5 = scmp.lt.s32.totalorder %s596_s26, %s596_s26 }
  0x38   : > { %p599_p12 = pnand %p597_p8, %p557_p13  ;;  %p606_p7 = por %p605_p5, %p604_p3 }
  0x3a   : > { %p600_p0 = pneg %p599_p12 }
  0x3c   : > { %p607_p10 = pnand %p606_p7, %p600_p0 }
  0x3e   : > { %610 = shalt.err (!%p607_p10)
}
  0x3f   : > { %486 = dma.hbm_to_vmem [thread:$0]  (!%p818_p11), %s1001_s2, 128, %s822_s28, [#allocation6]  }
  0x40   : > { %s32_s9 = sadd.s32 1, %s723_s16  ;;  %s41_s10 = sadd.s32 1, %s715_s14 }
  0x41   : > { %p34_p13 = scmp.ge.s32.totalorder %s32_s9, 2  ;;  %p48_p9 = scmp.ne.s32.totalorder %s715_s14, %s711_s13 }
  0x42   : > { %p49_p1 = scmp.eq.s32.totalorder %s727_s17, 0  ;;  %p497_p4 = scmp.lt.s32.totalorder %s727_s17, 2 }
  0x43   : > { %s1027_s9 = smov (%p34_p13, %s32_s9), 0  ;;  %p1013_p6 = scmp.ne.s32.totalorder %s1008_s21, 0 }
  0x44   : > { %p50_p2 = por %p49_p1, %p48_p9  ;;  %s36_s11 = ssub.s32 %s723_s16, %s1027_s9 }
  0x45   : > { %p881_p8 = por %p1013_p6, %p48_p9  ;;  %s170_s18 = sand.u32 1, %s715_s14  }
  0x46   : > { %p39_p12 = scmp.eq.s32.totalorder %s36_s11, 0  ;;  %s450_s28 = sshll.u32 %s170_s18, 3 }
  0x47   : > { %s466_s19 = sshll.u32 %s723_s16, 7  ;;  %s174_s21 = scalar_lea.vmem [#allocation2], %s450_s28 }
  0x48   : > { %s890_s25 = scalar_select %p39_p12, %s715_s14, %s41_s10  }
  0x49   : > { %s895_s4 = scalar_lea.hbm %s999_s0, %s466_s19  ;;  %s184_s5 = sshll.u32 %s174_s21, 4  ;;  %s903_s5 = int_to_ptr.vmem [resolvable:$true] %s184_s5 }
  0x4a   : > { %p899_p11 = pnand %p497_p4, %p50_p2  ;;  %s171_s26 = scalar_lea.sflag [#allocation3], %s170_s18 }
  0x4b   : > { %s611_s7 = scalar_lea.hbm %s895_s4, 128  ;;  %s616_s11 = scalar_lea.hbm %s999_s0, 256 }
  0x4c   : > { %p612_p0 = scmp.ne.s32.totalorder %s895_s4, %s611_s7  ;;  %p613_p3 = pneg %p899_p11 }
  0x4d   : > { %p617_p10 = scmp.lt.u32.totalorder %s895_s4, %s999_s0  ;;  %p618_p13 = scmp.lt.u32.totalorder %s616_s11, %s611_s7 }
  0x4e   : > { %p614_p5 = pnand %p613_p3, %p612_p0  ;;  %p620_p1 = scmp.lt.u32.totalorder %s611_s7, %s895_s4 }
  0x4f   : > { %p619_p9 = por %p618_p13, %p617_p10 }
  0x50   : > { %p615_p7 = pneg %p614_p5 }
  0x51   : > { %p621_p4 = por %p620_p1, %p619_p9 }
  0x53   : > { %p622_p2 = pnand %p621_p4, %p615_p7 }
  0x55   : > { %625 = shalt.err (!%p622_p2)
}
  0x56   : > { %s626_s18 = scalar_lea.vmem %s903_s5, 128  ;;  %s731_s27 = smov [#allocation2]  }
  0x57   : > { %p627_p6 = scmp.ne.s32.totalorder %s903_s5, %s626_s18  ;;  %s631_s30 = sshll.u32 %s731_s27, 4  ;;  %s632_s30 = int_to_ptr.vmem [resolvable:$false] %s631_s30 }
  0x58   : > { %s633_s21 = scalar_lea.vmem %s632_s30, 256  ;;  %p634_p5 = scmp.lt.s32.totalorder %s903_s5, %s632_s30 }
  0x59   : > { %p629_p12 = pnand %p627_p6, %p613_p3  ;;  %p635_p10 = scmp.lt.s32.totalorder %s633_s21, %s626_s18 }
  0x5b   : > { %p630_p0 = pneg %p629_p12  ;;  %p636_p13 = por %p635_p10, %p634_p5 }
  0x5d   : > { %p637_p9 = pnand %p636_p13, %p630_p0 }
  0x5f   : > { %640 = shalt.err (!%p637_p9)
}
  0x60   : > { %490 = dma.hbm_to_vmem [thread:$0]  (!%p899_p11), %s895_s4, 128, %s903_s5, %s171_s26  }
  0x61   : > { %p1016_p7 = scmp.ne.s32.totalorder %s1011_s24, 0 }
  0x62   : > { %s933_s7 = sand.u32 (!%p1016_p7), 1, %s711_s13   ;;  %p1017_p3 = scmp.ne.s32.totalorder (!%p1016_p7), %s1009_s22, 0 }
  0x63   : > { %193 = sbr.rel (%p1016_p7) target bundleno = 344 (0x158), region = 32  ;;  %s454_s8 = sshll.u32 (!%p1016_p7), %s933_s7, 3 }
  0x64   : > { %s196_s10 = scalar_lea.sflag (!%p1016_p7), [#allocation3], %s933_s7  ;;  %s199_s11 = scalar_lea.vmem (!%p1016_p7), [#allocation2], %s454_s8 }
  0x6a   : > { %694 = dma.done.wait (%p1017_p3), %s196_s10, 128  }
  0x6b   : > { %696 = vsyncadd (%p1017_p3), %s196_s10, 4294967168  ;;  %p1018_p1 = scmp.ne.s32.totalorder %s1007_s20, 0 }
  0x6d   : > { %698 = dma.done.wait (%p1018_p1), [#allocation6], 256  }
  0x6e   : > { %700 = vsyncadd (%p1018_p1), [#allocation6], 4294967040  ;;  %v732_v0 = vmov 0.0   ;;  %v733_v1 = vmov 0   ;;  %v233_v2 = vld [vmem:[%s199_s11] sm:$0xff]  ;;  %vm246_vm0 = vcmask 1043456  }
  0x6f   : > { %315 = vmatprep.mubr.f32.mxu0 %v732_v0  ;;  %553 = vset.pattern.permute.xlu0 %v733_v1  ;;  %v234_v3 = vld [vmem:[#allocation7] sm:$0xff]  ;;  %v241_v4 = vcombine.high %v233_v2, %v233_v2  ;;  %v232_v5 = vld [vmem:[#allocation5] sm:$0xff]  ;;  %vm242_vm1 = vcmask 31744   ;;  %s457_s22 = sshll.u32 %s933_s7, 4  ;;  %s467_s20 = sshll.u32 %s719_s15, 8 }
  0x70   : > { %237 = vperm.xlu0 %553, %v234_v3   ;;  %s229_s24 = scalar_lea.vmem [#allocation8], %s457_s22  ;;  %s950_s26 = scalar_lea.hbm %s1002_s3, %s467_s20 }
  0x71   : > { %458 = vmatprep.subr.msk.mxu0 %vm246_vm0, %v241_v4  ;;  %s341_s4 = sshll.u32 %s229_s24, 4  ;;  %s325_s28 = scalar_lea.sflag [#allocation4], %s933_s7  ;;  %s952_s4 = int_to_ptr.vmem [resolvable:$true] %s341_s4 }
  0x72   : > { %459 = vmatpush1.msk.msra.mxu0 %vm246_vm0, %v233_v2  ;;  %s641_s15 = scalar_lea.vmem %s952_s4, 256  ;;  %s734_s19 = smov [#allocation8]  }
  0x73   : > { %460 = vmatmul.mubr.msk.f32.vlgmr.msra.gmra.mrb[0].mxu0 %vm242_vm1, %v232_v5  ;;  %p642_p11 = scmp.ne.s32.totalorder %s952_s4, %s641_s15  ;;  %s645_s18 = sshll.u32 %s734_s19, 4  ;;  %s646_s18 = int_to_ptr.vmem [resolvable:$false] %s645_s18 }
  0x74   : > { %s647_s27 = scalar_lea.vmem %s646_s18, 512  ;;  %p648_p6 = scmp.lt.s32.totalorder %s952_s4, %s646_s18 }
  0x75   : > { %p643_p4 = pnand %p642_p11, %p881_p8  ;;  %p649_p12 = scmp.lt.s32.totalorder %s647_s27, %s641_s15 }
  0x77   : > { %p644_p2 = pneg %p643_p4  ;;  %p650_p0 = por %p649_p12, %p648_p6 }
  0x79   : > { %p651_p5 = pnand %p650_p0, %p644_p2 }
  0xef   : > { %v238_v6 = vpop.permute.xlu0 %237 }
 0x146   : > { %v317_v7 = vpop.f32.mrb[0].mxu0 }
 0x147   : > { %v318_v8 = vadd.f32 %v317_v7, %v238_v6  ;;  %v319_v9 = vpop.f32.mrb[1].mxu0 }
 0x148   : > { %v320_v10 = vadd.f32 %v319_v9, %v238_v6 }
 0x149   : > { %322 = vst [vmem:[%s229_s24] sm:$0xff] %v318_v8 }
 0x14a   : > { %323 = vst [vmem:[%s229_s24 + $0x8] sm:$0xff] %v320_v10 }
 0x14b   : > { %654 = shalt.err (!%p651_p5)
}
 0x14c   : > { %s655_s30 = scalar_lea.hbm %s950_s26, 256  ;;  %s659_s8 = scalar_lea.hbm %s1002_s3, 512 }
 0x14d   : > { %p656_p10 = scmp.ne.s32.totalorder %s950_s26, %s655_s30  ;;  %p660_p7 = scmp.lt.u32.totalorder %s950_s26, %s1002_s3 }
 0x14e   : > { %p661_p3 = scmp.lt.u32.totalorder %s659_s8, %s655_s30  ;;  %p663_p11 = scmp.lt.u32.totalorder %s655_s30, %s950_s26 }
 0x14f   : > { %p657_p13 = pnand %p656_p10, %p881_p8 }
 0x150   : > { %p662_p1 = por %p661_p3, %p660_p7 }
 0x151   : > { %p658_p9 = pneg %p657_p13 }
 0x152   : > { %p664_p4 = por %p663_p11, %p662_p1 }
 0x154   : > { %p665_p2 = pnand %p664_p4, %p658_p9 }
 0x156   : > { %668 = shalt.err (!%p665_p2)
}
 0x157   : > { %478 = dma.vmem_to_hbm [thread:$0]  (%p881_p8), %s952_s4, 256, %s950_s26, %s325_s28  }
 0x158 PF: > { %s353_s22 = sand.u32 1, %s707_s12   ;;  %p1019_p6 = scmp.ne.s32.totalorder %s1010_s23, 0 }
 0x159   : > { %p1020_p12 = scmp.ge.s32.totalorder %s727_s17, 2  ;;  %s354_s20 = scalar_lea.sflag [#allocation4], %s353_s22 }
 0x15b   : > { %p492_p0 = pnand %p1020_p12, %p1019_p6 }
 0x15d   : > { %702 = dma.done.wait (!%p492_p0), %s354_s20, 256  }
 0x15e   : > { %704 = vsyncadd (!%p492_p0), %s354_s20, 4294967040  ;;  %s20_s17 = sadd.s32 1, %s727_s17   ;;  %s1021_s12 = smov %s711_s13 }
 0x15f   : > { %p17_p5 = scmp.ge.s32.totalorder %s20_s17, 4   ;;  %s1022_s13 = smov %s715_s14 }
 0x160   : > { %s1023_s14 = smov %s890_s25  ;;  %s1024_s15 = smov %s723_s16 }
 0x161   : > { %s1025_s16 = smov %s1027_s9  ;;  %19 = sbr.rel (!%p17_p5) target bundleno = 7 (0x7), region = 85 }
 0x168   :  { %359 = vsyncpa [#allocation3], 1 }
 0x169   :  { %361 = vsyncpa [#allocation3 + $0x1], 1 }
 0x16a   :  { %362 = vsyncpa [#allocation6], 1 }
 0x16b   :  { %363 = vsyncpa [#allocation4], 1 }
 0x16c   :  { %365 = vsyncpa [#allocation4 + $0x1], 1 }

</bundles_post_ra>
